<compile_context>
chip_gen: v6e
topology: v6e:2x2x1
jax: 0.10.0
libtpu: 0.0.40
codegen_flags: <defaults>
</compile_context>

<pallas_src>
import jax
import jax.numpy as jnp
from jax.experimental import pallas as pl
from jax.experimental.pallas import tpu as pltpu


def se_kernel(x_ref, w1t_ref, w2t_ref, o_ref):
    # x_ref  : (Bt, C, HW)  batched input block
    # w1t_ref: (C, Cr)      fc1 weight, pre-transposed AND pre-scaled by 1/HW
    # w2t_ref: (Cr, C)      fc2 weight, pre-transposed
    # o_ref  : (Bt, C, HW)
    x = x_ref[...]                                             # native dtype, no blanket upcast

    # Squeeze: sum over spatial dims with f32 accumulation (the 1/HW of the
    # mean is folded into w1t so the kernel only needs a sum).
    pooled = jnp.sum(x, axis=-1, dtype=jnp.float32)            # (Bt, C) f32

    # Excitation on the VPU (broadcast-mul + cross-sublane reduce); the MXU
    # would waste a full systolic pass for these tiny M/N/K.
    w1t = w1t_ref[...]                                         # (C, Cr) f32
    w2t = w2t_ref[...]                                         # (Cr, C) f32
    h = jnp.sum(pooled[:, :, None] * w1t[None, :, :], axis=1)  # (Bt, Cr)
    h = jnp.maximum(h, 0.0)                                    # ReLU
    s = jnp.sum(h[:, :, None] * w2t[None, :, :], axis=1)       # (Bt, C)

    # Sigmoid via the otherwise-idle EUP slot: exp + approximate reciprocal.
    s = pl.reciprocal(1.0 + jnp.exp(-s), approx=True)          # (Bt, C) f32

    # Scale: broadcast the channel gates over HW, in the input dtype.
    o_ref[...] = (x * s[:, :, None].astype(x.dtype)).astype(o_ref.dtype)


def se_block(x, w1, w2, *, block_batch=None):
    """x: (B, C, H, W) NCHW. w1: (C//r, C). w2: (C, C//r). Returns (B, C, H, W)."""
    B, C, H, W = x.shape
    HW = H * W
    Cr = w1.shape[0]
    assert w1.shape == (Cr, C) and w2.shape == (C, Cr)

    if block_batch is None:
        block_batch = B  # whole batch per grid step (best on single-TC v5e/v6e)
    assert B % block_batch == 0
    grid = (B // block_batch,)

    x3 = x.reshape(B, C, HW)
    # One-time host-side weight transforms: transpose + fold the 1/HW of the mean.
    w1_t = (jnp.asarray(w1).T / float(HW)).astype(jnp.float32)  # (C, Cr)
    w2_t = jnp.asarray(w2).T.astype(jnp.float32)                # (Cr, C)

    out = pl.pallas_call(
        se_kernel,
        out_shape=jax.ShapeDtypeStruct((B, C, HW), x.dtype),
        grid_spec=pltpu.PrefetchScalarGridSpec(
            num_scalar_prefetch=0,
            grid=grid,
            in_specs=[
                pl.BlockSpec((block_batch, C, HW), lambda b: (b, 0, 0)),
                pl.BlockSpec((C, Cr), lambda b: (0, 0)),
                pl.BlockSpec((Cr, C), lambda b: (0, 0)),
            ],
            out_specs=pl.BlockSpec((block_batch, C, HW), lambda b: (b, 0, 0)),
        ),
        compiler_params=pltpu.CompilerParams(
            dimension_semantics=("parallel",),
        ),
    )(x3, w1_t, w2_t)

    return out.reshape(B, C, H, W)


def se_block_ref(x, w1, w2):
    """Pure-JAX reference matching the PyTorch forward."""
    pooled = jnp.mean(x, axis=(2, 3))                # (B, C)
    h = jnp.maximum(pooled @ w1.T, 0.0)              # (B, C//r)
    s = jax.nn.sigmoid(h @ w2.T)                     # (B, C)
    return x * s[:, :, None, None]


if __name__ == "__main__":
    # SEBlock(in_channel=12, r=6) -> fc1: (2, 12), fc2: (12, 2)
    B, C, H, W = 2, 12, 16, 16
    r = 6
    Cr = C // r

    key = jax.random.PRNGKey(0)
    kx, k1, k2 = jax.random.split(key, 3)
    x = jax.random.normal(kx, (B, C, H, W), dtype=jnp.float32)
    # Deterministic synthetic weights (roughly Kaiming-scale).
    w1 = jax.random.normal(k1, (Cr, C), dtype=jnp.float32) * (1.0 / jnp.sqrt(C))
    w2 = jax.random.normal(k2, (C, Cr), dtype=jnp.float32) * (1.0 / jnp.sqrt(Cr))

    out = se_block(x, w1, w2)
    out = jax.block_until_ready(out)

    ref = se_block_ref(x, w1, w2)
    assert out.shape == (B, C, H, W)
    # Tolerance loosened slightly vs. exact math: sigmoid uses the EUP
    # approximate reciprocal (pl.reciprocal(..., approx=True)).
    assert jnp.allclose(out, ref, atol=2e-3, rtol=2e-3), "mismatch vs reference"

    print("KERNEL_OK")
</pallas_src>

<mosaic_0001>
module attributes {stable_mosaic.version = 11 : i64} {
  func.func @se_kernel(%arg0: i32, %arg1: memref<2x12x256xf32, #tpu.memory_space<vmem>>, %arg2: memref<12x2xf32, #tpu.memory_space<vmem>>, %arg3: memref<2x12xf32, #tpu.memory_space<vmem>>, %arg4: memref<2x12x256xf32, #tpu.memory_space<vmem>>) attributes {dimension_semantics = [#tpu.dimension_semantics<parallel>], iteration_bounds = array<i64: 1>, scalar_prefetch = 0 : i64, scratch_operands = 0 : i64, tpu.core_type = #tpu.core_type<tc>, window_params = [{transform_indices = @transform_0, window_bounds = array<i64: 2, 12, 256>}, {pipeline_mode = #tpu.pipeline_mode<synchronous>, transform_indices = @transform_1, window_bounds = array<i64: 12, 2>}, {pipeline_mode = #tpu.pipeline_mode<synchronous>, transform_indices = @transform_2, window_bounds = array<i64: 2, 12>}, {transform_indices = @transform_3, window_bounds = array<i64: 2, 12, 256>}]} {
    %c0 = arith.constant 0 : index
    %c0_0 = arith.constant 0 : index
    %c0_1 = arith.constant 0 : index
    %0 = vector.load %arg1[%c0, %c0_0, %c0_1] : memref<2x12x256xf32, #tpu.memory_space<vmem>>, vector<2x12x256xf32>
    %cst = arith.constant dense<0.000000e+00> : vector<2x12xf32>
    %1 = vector.multi_reduction <add>, %0, %cst [2] : vector<2x12x256xf32> to vector<2x12xf32>
    %c0_2 = arith.constant 0 : index
    %c0_3 = arith.constant 0 : index
    %2 = vector.load %arg2[%c0_2, %c0_3] : memref<12x2xf32, #tpu.memory_space<vmem>>, vector<12x2xf32>
    %c0_4 = arith.constant 0 : index
    %c0_5 = arith.constant 0 : index
    %3 = vector.load %arg3[%c0_4, %c0_5] : memref<2x12xf32, #tpu.memory_space<vmem>>, vector<2x12xf32>
    %4 = vector.shape_cast %1 : vector<2x12xf32> to vector<2x12x1xf32>
    %5 = vector.shape_cast %2 : vector<12x2xf32> to vector<1x12x2xf32>
    %6 = vector.broadcast %4 : vector<2x12x1xf32> to vector<2x12x2xf32>
    %7 = vector.broadcast %5 : vector<1x12x2xf32> to vector<2x12x2xf32>
    %8 = arith.mulf %6, %7 : vector<2x12x2xf32>
    %cst_6 = arith.constant dense<0.000000e+00> : vector<2x2xf32>
    %9 = vector.multi_reduction <add>, %8, %cst_6 [1] : vector<2x12x2xf32> to vector<2x2xf32>
    %cst_7 = arith.constant 0.000000e+00 : f32
    %10 = vector.broadcast %cst_7 : f32 to vector<2x2xf32>
    %11 = arith.maximumf %9, %10 : vector<2x2xf32>
    %12 = vector.shape_cast %11 : vector<2x2xf32> to vector<2x2x1xf32>
    %13 = vector.shape_cast %3 : vector<2x12xf32> to vector<1x2x12xf32>
    %14 = vector.broadcast %12 : vector<2x2x1xf32> to vector<2x2x12xf32>
    %15 = vector.broadcast %13 : vector<1x2x12xf32> to vector<2x2x12xf32>
    %16 = arith.mulf %14, %15 : vector<2x2x12xf32>
    %cst_8 = arith.constant dense<0.000000e+00> : vector<2x12xf32>
    %17 = vector.multi_reduction <add>, %16, %cst_8 [1] : vector<2x2x12xf32> to vector<2x12xf32>
    %cst_9 = arith.constant 0.000000e+00 : f32
    %18 = vector.broadcast %cst_9 : f32 to vector<2x12xf32>
    %19 = arith.subf %18, %17 : vector<2x12xf32>
    %20 = math.exp %19 : vector<2x12xf32>
    %cst_10 = arith.constant 1.000000e+00 : f32
    %21 = vector.broadcast %cst_10 : f32 to vector<2x12xf32>
    %22 = arith.addf %21, %20 : vector<2x12xf32>
    %23 = tpu.reciprocal %22 {approx = true} : vector<2x12xf32> -> vector<2x12xf32>
    %24 = vector.shape_cast %23 : vector<2x12xf32> to vector<2x12x1xf32>
    %25 = vector.broadcast %24 : vector<2x12x1xf32> to vector<2x12x256xf32>
    %26 = arith.mulf %0, %25 : vector<2x12x256xf32>
    %c0_11 = arith.constant 0 : index
    %c0_12 = arith.constant 0 : index
    %c0_13 = arith.constant 0 : index
    %27 = vector.load %arg4[%c0_11, %c0_12, %c0_13] : memref<2x12x256xf32, #tpu.memory_space<vmem>>, vector<2x12x256xf32>
    tpu.vector_store %arg4[%c0_11, %c0_12, %c0_13], %26 {strides = array<i32>} : memref<2x12x256xf32, #tpu.memory_space<vmem>>, vector<2x12x256xf32>,
    return
  }
  func.func @transform_0(%arg0: i32) -> (i32, i32, i32) {
    %c0_i32 = arith.constant 0 : i32
    %c0_i32_0 = arith.constant 0 : i32
    %c0_i32_1 = arith.constant 0 : i32
    return %arg0, %c0_i32, %c0_i32_0 : i32, i32, i32
  }
  func.func @transform_1(%arg0: i32) -> (i32, i32) {
    %c0_i32 = arith.constant 0 : i32
    %c0_i32_0 = arith.constant 0 : i32
    %c0_i32_1 = arith.constant 0 : i32
    return %c0_i32, %c0_i32_0 : i32, i32
  }
  func.func @transform_2(%arg0: i32) -> (i32, i32) {
    %c0_i32 = arith.constant 0 : i32
    %c0_i32_0 = arith.constant 0 : i32
    %c0_i32_1 = arith.constant 0 : i32
    return %c0_i32, %c0_i32_0 : i32, i32
  }
  func.func @transform_3(%arg0: i32) -> (i32, i32, i32) {
    %c0_i32 = arith.constant 0 : i32
    %c0_i32_0 = arith.constant 0 : i32
    %c0_i32_1 = arith.constant 0 : i32
    return %arg0, %c0_i32, %c0_i32_0 : i32, i32, i32
  }
}

</mosaic_0001>

<bundles_post_ra>
// kernel: tpu_custom_call.1
= control target key start
LH: loop header
LB: loop body
LE: loop exit
PB: predicated region body
PF: predicated region fallthrough
CT: control target
= control target key end

     0   :  { %vm25_vm0 = vcmask 1043456   ;;  %vm46_vm1 = vcmask 15360   ;;  %vm48_vm2 = vcmask 11264   ;;  %vm76_vm3 = vcmask 91136   ;;  %s256_s0 = inlined_call_operand.vmem [shape: f32[2,12,256], index: 0, kind: input, shape index: {}]   ;;  %s257_s1 = inlined_call_operand.vmem [shape: f32[12,2], index: 1, kind: input, shape index: {}]   ;;  %s258_s2 = inlined_call_operand.vmem [shape: f32[2,12], index: 2, kind: input, shape index: {}]   ;;  %s259_s3 = inlined_call_operand.vmem [shape: f32[2,12,256], index: 3, kind: output, shape index: {}]  }
   0x1   :  { %v166_v0 = vld [vmem:[%s256_s0 + $0x20] sm:$0xff]  ;;  %v171_v1 = vld [vmem:[%s256_s0 + $0x28] sm:$0xff]  ;;  %v188_v5 = vld [vmem:[%s256_s0 + $0x30] sm:$0xf] }
   0x2   :  { %v176_v2 = vld [vmem:[%s256_s0] sm:$0xff]  ;;  %v31_v3 = vadd.f32 %v171_v1, %v166_v0  ;;  %v183_v4 = vld [vmem:[%s256_s0 + $0x8] sm:$0xff]  ;;  %v193_v6 = vld [vmem:[%s256_s0 + $0x38] sm:$0xf]  ;;  %v34_v8 = vsel %vm25_vm0, %v188_v5, 0.0 }
   0x3   :  { %v22_v7 = vadd.f32 %v183_v4, %v176_v2  ;;  %v35_v9 = vsel %vm25_vm0, %v193_v6, 0.0  ;;  %v204_v10 = vld [vmem:[%s256_s0 + $0x10] sm:$0xf]  ;;  %v209_v11 = vld [vmem:[%s256_s0 + $0x18] sm:$0xf]  ;;  %v39_v16 = vld [vmem:[%s257_s1] sm:$0xff] }
   0x4   :  { %32 = vadd.xlane.f32.xlu1 %v31_v3  ;;  %v36_v12 = vadd.f32 %v35_v9, %v34_v8  ;;  %v26_v13 = vsel %vm25_vm0, %v204_v10, 0.0  ;;  %v27_v14 = vsel %vm25_vm0, %v209_v11, 0.0  ;;  %v40_v20 = vld [vmem:[%s257_s1 + $0x8] sm:$0xf]  ;;  %v41_v46 = vld [vmem:[%s258_s2] sm:$0x3] }
   0x5   :  { %23 = vadd.xlane.f32.xlu0 %v22_v7  ;;  %v28_v15 = vadd.f32 %v27_v14, %v26_v13 }
   0x8   :  { %37 = vadd.xlane.f32.xlu1 %v36_v12 }
   0x9   :  { %29 = vadd.xlane.f32.xlu0 %v28_v15 }
  0x8d   :  { %v33_v17 = vpop.xlane.xlu1 %32 }
  0x8e   :  { %v44_v18 = vmul.f32 %v39_v16, %v33_v17  ;;  %v24_v19 = vpop.xlane.xlu0 %23 }
  0x8f   :  { %v42_v21 = vmul.f32 %v39_v16, %v24_v19 }
  0x90   :  { %v57_v23 = vsel %vm46_vm1, %v44_v18, 0.0 }
  0x91   :  { %v38_v22 = vpop.xlane.xlu1 %37  ;;  %v47_v28 = vsel %vm46_vm1, %v42_v21, 0.0 }
  0x92   :  { %v45_v24 = vmul.f32 %v40_v20, %v38_v22  ;;  %v30_v25 = vpop.xlane.xlu0 %29 }
  0x93   :  { %v43_v26 = vmul.f32 %v40_v20, %v30_v25 }
  0x94   :  { %v58_v27 = vsel %vm48_vm2, %v45_v24, 0.0 }
  0x95   :  { %v59_v29 = vadd.f32 %v58_v27, %v57_v23  ;;  %v49_v30 = vsel %vm48_vm2, %v43_v26, 0.0 }
  0x96   :  { %v50_v31 = vadd.f32 %v49_v30, %v47_v28 }
  0x97   :  { %v60_v32 = vrot.slane %v59_v29, 4 }
  0x98   :  { %v51_v33 = vrot.slane %v50_v31, 4 }
  0x99   :  { %v61_v34 = vadd.f32 %v60_v32, %v59_v29 }
  0x9a   :  { %v52_v35 = vadd.f32 %v51_v33, %v50_v31 }
  0x9b   :  { %v62_v36 = vrot.slane %v61_v34, 2 }
  0x9c   :  { %v53_v37 = vrot.slane %v52_v35, 2 }
  0x9d   :  { %v63_v38 = vadd.f32 %v62_v36, %v61_v34 }
  0x9e   :  { %v54_v39 = vadd.f32 %v53_v37, %v52_v35 }
  0x9f   :  { %v64_v40 = vrot.slane %v63_v38, 1 }
  0xa0   :  { %v55_v41 = vrot.slane %v54_v39, 1 }
  0xa1   :  { %v65_v42 = vadd.f32 %v64_v40, %v63_v38 }
  0xa2   :  { %v56_v43 = vadd.f32 %v55_v41, %v54_v39 }
  0xa3   :  { %v67_v44 = vmax.f32 %v65_v42, 0.0 }
  0xa4   :  { %v66_v45 = vmax.f32 %v56_v43, 0.0 }
  0xa5   :  { %72 = vbcast.lane.b32.xlu1 %v67_v44, 256 }
  0xa6   :  { %69 = vbcast.lane.b32.xlu0 %v66_v45, 256 }
 0x117   :  { %v73_v47 = vpop.permute.xlu1 %72 }
 0x118   :  { %v75_v48 = vmul.f32 %v73_v47, %v41_v46  ;;  %v70_v49 = vpop.permute.xlu0 %69 }
 0x119   :  { %v74_v50 = vmul.f32 %v70_v49, %v41_v46 }
 0x11a   :  { %v84_v51 = vsel %vm76_vm3, %v75_v48, 0.0 }
 0x11b   :  { %v85_v52 = vrot.slane %v84_v51, 4  ;;  %v77_v53 = vsel %vm76_vm3, %v74_v50, 0.0 }
 0x11c   :  { %v78_v54 = vrot.slane %v77_v53, 4 }
 0x11d   :  { %v86_v55 = vadd.f32 %v85_v52, %v84_v51 }
 0x11e   :  { %v79_v56 = vadd.f32 %v78_v54, %v77_v53 }
 0x11f   :  { %v87_v57 = vrot.slane %v86_v55, 2 }
 0x120   :  { %v80_v58 = vrot.slane %v79_v56, 2 }
 0x121   :  { %v88_v59 = vadd.f32 %v87_v57, %v86_v55 }
 0x122   :  { %v81_v60 = vadd.f32 %v80_v58, %v79_v56 }
 0x123   :  { %v89_v61 = vrot.slane %v88_v59, 1 }
 0x124   :  { %v82_v62 = vrot.slane %v81_v60, 1 }
 0x125   :  { %v90_v63 = vadd.f32 %v89_v61, %v88_v59 }
 0x126   :  { %v83_v3 = vadd.f32 %v82_v62, %v81_v60 }
 0x127   :  { %v92_v7 = vsub.f32 0.0, %v90_v63 }
 0x128   :  { %v91_v8 = vsub.f32 0.0, %v83_v3 }
 0x129   :  { %v95_v9 = vmul.f32 1.442695, %v92_v7 }
 0x12a   :  { %v93_v12 = vmul.f32 1.442695, %v91_v8 }
 0x12b   :  { %135 = vpow2.f32 %v95_v9 }
 0x12c   :  { %137 = vpow2.f32 %v93_v12 }
 0x138   :  { %v136_v13 = vpop.eup %135 }
 0x139   :  { %v138_v14 = vpop.eup %137  ;;  %v98_v15 = vadd.f32 1.0, %v136_v13 }
 0x13a   :  { %v97_v16 = vadd.f32 1.0, %v138_v14 }
 0x13b   :  { %139 = vrcp.f32 %v98_v15 }
 0x13c   :  { %141 = vrcp.f32 %v97_v16 }
 0x148   :  { %v140_v17 = vpop.eup %139 }
 0x149   :  { %v142_v18 = vpop.eup %141  ;;  %109 = vbcast.lane.b32.xlu0 %v140_v17, 256 }
 0x14a   :  { %102 = vbcast.lane.b32.xlu1 %v142_v18, 256 }
 0x14e   :  { %106 = vbcast.lane.b32.xlu1 %v142_v18, 264 }
 0x152   :  { %113 = vbcast.lane.b32.xlu1 %v140_v17, 264 }
 0x1bb   :  { %v110_v19 = vpop.permute.xlu0 %109 }
 0x1bc   :  { %v103_v20 = vpop.permute.xlu1 %102  ;;  %v119_v21 = vmul.f32 %v110_v19, %v166_v0  ;;  %v120_v22 = vmul.f32 %v110_v19, %v171_v1 }
 0x1bd   :  { %v115_v23 = vmul.f32 %v103_v20, %v176_v2  ;;  %v116_v24 = vmul.f32 %v103_v20, %v183_v4 }
 0x1be   :  { %127 = vst [vmem:[%s259_s3 + $0x20] sm:$0xff] %v119_v21  ;;  %128 = vst [vmem:[%s259_s3 + $0x28] sm:$0xff] %v120_v22 }
 0x1bf   :  { %123 = vst [vmem:[%s259_s3] sm:$0xff] %v115_v23  ;;  %124 = vst [vmem:[%s259_s3 + $0x8] sm:$0xff] %v116_v24 }
 0x1c0   :  { %v107_v0 = vpop.permute.xlu1 %106 }
 0x1c1   :  { %v117_v1 = vmul.f32 %v107_v0, %v204_v10  ;;  %v118_v2 = vmul.f32 %v107_v0, %v209_v11 }
 0x1c3   :  { %125 = vst [vmem:[%s259_s3 + $0x10] sm:$0xf] %v117_v1  ;;  %126 = vst [vmem:[%s259_s3 + $0x18] sm:$0xf] %v118_v2 }
 0x1c4   :  { %v114_v4 = vpop.permute.xlu1 %113 }
 0x1c5   :  { %v121_v25 = vmul.f32 %v114_v4, %v188_v5  ;;  %v122_v26 = vmul.f32 %v114_v4, %v193_v6 }
 0x1c7   :  { %129 = vst [vmem:[%s259_s3 + $0x30] sm:$0xf] %v121_v25  ;;  %130 = vst [vmem:[%s259_s3 + $0x38] sm:$0xf] %v122_v26 }

</bundles_post_ra>
